<compile_context>
chip_gen: v6e
topology: v6e:2x2x1
jax: 0.10.0
libtpu: 0.0.40
codegen_flags: <defaults>
</compile_context>

<pallas_src>
import functools
import math

import jax
import jax.numpy as jnp
from jax.experimental import pallas as pl
from jax.experimental.pallas import tpu as pltpu


# ------------------------------- hardware ----------------------------------- #

def _vmem_capacity_bytes():
    """Physical VMEM of the attached TPU (v5e/v6e: 128 MiB, v7x: 64 MiB).
    Falls back to the conservative v7x size if the query is unavailable."""
    try:
        return int(pltpu.get_tpu_info().vmem_capacity_bytes)
    except Exception:
        return 64 * 1024 * 1024


def _is_big_vmem():
    return _vmem_capacity_bytes() >= (100 << 20)


def _compiler_params(semantics, working_set_bytes):
    # Per-generation scoped-VMEM budget: cap just under the physical VMEM of
    # the part we're actually on (review: don't apply the 60 MiB v7x clamp to
    # 128 MiB v5e/v6e parts), with extra headroom for compiler scratch.
    cap = _vmem_capacity_bytes()
    ceiling = max(16 << 20, cap - (4 << 20))
    limit = int(min(ceiling, max(16 << 20, working_set_bytes + (8 << 20))))
    return pltpu.CompilerParams(dimension_semantics=semantics,
                                vmem_limit_bytes=limit)


def _tile(dim, target, align):
    """Largest tile <= target that is `align`-aligned and divides `dim`.
    Falls back to the full dimension (always a legal block) when `dim` is
    small or not alignable."""
    if dim <= target or dim % align != 0:
        return dim
    t = max(align, (target // align) * align)
    while dim % t != 0:
        t -= align
    return t


# ----------------------------- Pallas kernels ------------------------------- #

def linear_kernel_acc(x_ref, w_ref, b_ref, o_ref, acc_ref):
    # x block: (tm, tk); w block: (tk, tn) — weight pre-transposed in the
    # wrapper so the MXU streams the RHS natively (no in-kernel relayout);
    # b block: (1, tn) f32; o block: (tm, tn).
    kk = pl.program_id(2)

    @pl.when(kk == 0)
    def _():
        acc_ref[...] = jnp.zeros_like(acc_ref)

    x = x_ref[...]
    w = w_ref[...]
    if x.dtype != w.dtype:      # only the raw f32 module inputs hit this cast
        x = x.astype(w.dtype)
    acc_ref[...] += jnp.dot(x, w, preferred_element_type=jnp.float32)

    @pl.when(kk == pl.num_programs(2) - 1)
    def _():
        o_ref[...] = (acc_ref[...] + b_ref[...]).astype(o_ref.dtype)


def linear_kernel_single(x_ref, w_ref, b_ref, o_ref):
    # Specialization for a 1-step K reduction (tk == Cin): no scratch
    # accumulator and no init/finalize phases (review item).
    x = x_ref[...]
    w = w_ref[...]
    if x.dtype != w.dtype:
        x = x.astype(w.dtype)
    acc = jnp.dot(x, w, preferred_element_type=jnp.float32)
    o_ref[...] = (acc + b_ref[...]).astype(o_ref.dtype)


def attn_kernel(q_ref, k_ref, v_ref, o_ref, a_ref, o_acc,
                *, num_heads, head_dim):
    # q block: (1, tq, C); k/v blocks: (1, Nk, C); o block: (1, tq, C);
    # a block: (1, H, tq, Nk).  C = H*d stays on the lane axis.
    q = q_ref[0]            # (tq, C)  — already bf16 in the bf16 path
    k = k_ref[0]            # (Nk, C)
    v = v_ref[0]            # (Nk, C)

    # Fold the 1/sqrt(d) softmax scale into q once on (tq, C) instead of
    # scaling each (tq, Nk) score matrix (saves H*tq*Nk VALU multiplies).
    scale = jnp.asarray(1.0 / math.sqrt(head_dim), dtype=q.dtype)
    qs = q * scale

    for h in range(num_heads):          # static unroll, H is small
        lo = h * head_dim
        hi = lo + head_dim
        # scores: contract head_dim of q and k (q @ k^T) on the MXU, f32 acc.
        s = jax.lax.dot_general(
            qs[:, lo:hi], k[:, lo:hi], (((1,), (1,)), ((), ())),
            preferred_element_type=jnp.float32)               # (tq, Nk)

        # numerically stable softmax along the key axis; exact reciprocal on
        # the (tq, 1) column — attn is an API output, rows must sum to 1.
        m = jnp.max(s, axis=-1, keepdims=True)
        e = jnp.exp(s - m)
        l = jnp.sum(e, axis=-1, keepdims=True)
        p = e * (1.0 / l)

        a_ref[0, h] = p.astype(a_ref.dtype)

        # per-head write into the (tq, C) f32 scratch closes this head's live
        # range (no outs-list + concatenate epilogue).
        o_acc[:, lo:hi] = jnp.dot(p.astype(v.dtype), v[:, lo:hi],
                                  preferred_element_type=jnp.float32)

    # single lane-dense (tq, C) store — head merge is free, not an XLA op.
    o_ref[0] = o_acc[...].astype(o_ref.dtype)


# ------------------------------ Pallas wrappers ------------------------------ #

def pallas_linear(x2d, wt, b, *, out_dtype=None,
                  tm_target=None, tn_target=None, tk_target=512):
    """x2d: (M, Cin); wt: (Cin, Cout) pre-transposed (and possibly pre-cast to
    bf16) by the caller; b: (Cout,).  Returns (M, Cout) in out_dtype."""
    M, Cin = x2d.shape
    Cin2, Cout = wt.shape
    assert Cin == Cin2
    out_dtype = out_dtype if out_dtype is not None else x2d.dtype

    big = _is_big_vmem()
    tm_target = tm_target or (512 if big else 256)
    tn_target = tn_target or (512 if big else 256)

    tm = _tile(M, tm_target, 8)
    tn = _tile(Cout, tn_target, 128)
    tk = _tile(Cin, tk_target, 128)
    gk = Cin // tk

    b2 = b.astype(jnp.float32).reshape(1, Cout)

    x_it = x2d.dtype.itemsize
    w_it = wt.dtype.itemsize
    o_it = jnp.dtype(out_dtype).itemsize
    block_bytes = tm * tk * x_it + tk * tn * w_it + 4 * tn + tm * tn * o_it
    working = 2 * block_bytes + 4 * tm * tn          # 2x double-buffer + acc

    out_shape = jax.ShapeDtypeStruct((M, Cout), out_dtype)

    if gk == 1:
        return pl.pallas_call(
            linear_kernel_single,
            out_shape=out_shape,
            grid=(M // tm, Cout // tn),
            in_specs=[
                pl.BlockSpec((tm, tk), lambda i, j: (i, 0)),
                pl.BlockSpec((tk, tn), lambda i, j: (0, j)),
                pl.BlockSpec((1, tn), lambda i, j: (0, j)),
            ],
            out_specs=pl.BlockSpec((tm, tn), lambda i, j: (i, j)),
            compiler_params=_compiler_params(("parallel", "parallel"), working),
        )(x2d, wt, b2)

    return pl.pallas_call(
        linear_kernel_acc,
        out_shape=out_shape,
        grid=(M // tm, Cout // tn, gk),
        in_specs=[
            pl.BlockSpec((tm, tk), lambda i, j, kk: (i, kk)),
            pl.BlockSpec((tk, tn), lambda i, j, kk: (kk, j)),
            pl.BlockSpec((1, tn), lambda i, j, kk: (0, j)),
        ],
        out_specs=pl.BlockSpec((tm, tn), lambda i, j, kk: (i, j)),
        scratch_shapes=[pltpu.VMEM((tm, tn), jnp.float32)],
        compiler_params=_compiler_params(
            ("parallel", "parallel", "arbitrary"), working),
    )(x2d, wt, b2)


def pallas_attention(qp, kp, vp, num_heads, *, out_dtype=None,
                     attn_dtype=jnp.float32, tq_target=None):
    """qp: (B, Nq, C), kp/vp: (B, Nk, C) with C = num_heads * head_dim.
    Returns (out (B, Nq, C), attn (B, H, Nq, Nk))."""
    B, Nq, C = qp.shape
    Nk = kp.shape[1]
    assert C % num_heads == 0
    head_dim = C // num_heads
    out_dtype = out_dtype if out_dtype is not None else qp.dtype
    # 256 amortizes the 2x256x256 MXU fill/drain on v6e/v7x; small Nq falls
    # back to the full dimension anyway.
    tq_target = tq_target or 256

    tq = _tile(Nq, tq_target, 8)
    grid = (B, Nq // tq)

    it = qp.dtype.itemsize
    a_it = jnp.dtype(attn_dtype).itemsize
    o_it = jnp.dtype(out_dtype).itemsize
    block_bytes = (tq * C * it + 2 * Nk * C * it + tq * C * o_it
                   + num_heads * tq * Nk * a_it)
    # include in-kernel softmax intermediates (score/exp/prob f32 live set)
    # and the (tq, C) f32 output scratch (review item for v7x).
    intermediates = 4 * (3 * tq * Nk + 2 * tq + tq * C)
    working = 2 * block_bytes + intermediates + 4 * tq * C

    kernel = functools.partial(attn_kernel, num_heads=num_heads,
                               head_dim=head_dim)
    return pl.pallas_call(
        kernel,
        out_shape=(
            jax.ShapeDtypeStruct((B, Nq, C), out_dtype),
            jax.ShapeDtypeStruct((B, num_heads, Nq, Nk), attn_dtype),
        ),
        grid=grid,
        in_specs=[
            pl.BlockSpec((1, tq, C), lambda b, qi: (b, qi, 0)),
            pl.BlockSpec((1, Nk, C), lambda b, qi: (b, 0, 0)),
            pl.BlockSpec((1, Nk, C), lambda b, qi: (b, 0, 0)),
        ],
        out_specs=(
            pl.BlockSpec((1, tq, C), lambda b, qi: (b, qi, 0)),
            pl.BlockSpec((1, num_heads, tq, Nk), lambda b, qi: (b, 0, qi, 0)),
        ),
        scratch_shapes=[pltpu.VMEM((tq, C), jnp.float32)],
        compiler_params=_compiler_params(("parallel", "parallel"), working),
    )(qp, kp, vp)


# ------------------------------ Module (glue) -------------------------------- #

def init_attention_params(key, embedding_dim, num_heads, downsample_rate=1,
                          dtype=jnp.float32):
    internal_dim = embedding_dim // downsample_rate
    assert internal_dim % num_heads == 0, "num_heads must divide embedding_dim."
    ks = jax.random.split(key, 8)
    scale_in = 1.0 / math.sqrt(embedding_dim)
    scale_int = 1.0 / math.sqrt(internal_dim)
    return {
        "q_w": jax.random.normal(ks[0], (internal_dim, embedding_dim), dtype) * scale_in,
        "q_b": jax.random.normal(ks[1], (internal_dim,), dtype) * scale_in,
        "k_w": jax.random.normal(ks[2], (internal_dim, embedding_dim), dtype) * scale_in,
        "k_b": jax.random.normal(ks[3], (internal_dim,), dtype) * scale_in,
        "v_w": jax.random.normal(ks[4], (internal_dim, embedding_dim), dtype) * scale_in,
        "v_b": jax.random.normal(ks[5], (internal_dim,), dtype) * scale_in,
        "out_w": jax.random.normal(ks[6], (embedding_dim, internal_dim), dtype) * scale_int,
        "out_b": jax.random.normal(ks[7], (embedding_dim,), dtype) * scale_int,
    }


def attention_forward(params, q, k, v, num_heads, *, use_bf16=False,
                      attn_dtype=None):
    """Mirrors Attention.forward: returns (out (B,Nq,E), attn (B,H,Nq,Nk))."""
    B, Nq, E = q.shape
    Nk = k.shape[1]
    internal = params["q_w"].shape[0]
    in_dtype = q.dtype
    proj_dtype = jnp.bfloat16 if use_bf16 else in_dtype
    attn_dtype = attn_dtype if attn_dtype is not None else jnp.float32

    # One-time weight prep OUTSIDE the kernels: PyTorch (Cout, Cin) ->
    # (Cin, Cout) so the MXU streams the RHS natively, and bf16 pre-cast so
    # weight DMA bytes are halved in the bf16 path.
    def prep_w(w):
        wt = jnp.transpose(w)
        return wt.astype(jnp.bfloat16) if use_bf16 else wt

    qwt, kwt, vwt, owt = (prep_w(params["q_w"]), prep_w(params["k_w"]),
                          prep_w(params["v_w"]), prep_w(params["out_w"]))

    # projections (tiled Pallas matmuls); outputs emitted directly in bf16 in
    # the bf16 path so q/k/v enter the attention kernel at half the bytes.
    qp = pallas_linear(q.reshape(B * Nq, E), qwt, params["q_b"],
                       out_dtype=proj_dtype).reshape(B, Nq, internal)
    kp = pallas_linear(k.reshape(B * Nk, E), kwt, params["k_b"],
                       out_dtype=proj_dtype).reshape(B, Nk, internal)
    vp = pallas_linear(v.reshape(B * Nk, E), vwt, params["v_b"],
                       out_dtype=proj_dtype).reshape(B, Nk, internal)

    # scaled dot-product attention over all heads (Pallas kernel)
    o, attn = pallas_attention(qp, kp, vp, num_heads,
                               out_dtype=proj_dtype, attn_dtype=attn_dtype)

    # output projection (head merge already done lane-dense inside the kernel)
    out = pallas_linear(o.reshape(B * Nq, internal), owt, params["out_b"],
                        out_dtype=in_dtype).reshape(B, Nq, E)
    return out, attn


# ------------------------------ Pure-JAX reference --------------------------- #

def attention_reference(params, q, k, v, num_heads):
    B, Nq, _ = q.shape
    Nk = k.shape[1]
    internal = params["q_w"].shape[0]
    d = internal // num_heads

    qp = q @ params["q_w"].T + params["q_b"]
    kp = k @ params["k_w"].T + params["k_b"]
    vp = v @ params["v_w"].T + params["v_b"]

    qh = qp.reshape(B, Nq, num_heads, d).transpose(0, 2, 1, 3)
    kh = kp.reshape(B, Nk, num_heads, d).transpose(0, 2, 1, 3)
    vh = vp.reshape(B, Nk, num_heads, d).transpose(0, 2, 1, 3)

    s = jnp.einsum("bhqd,bhkd->bhqk", qh, kh) / math.sqrt(d)
    attn = jax.nn.softmax(s, axis=-1)
    oh = jnp.einsum("bhqk,bhkd->bhqd", attn, vh)
    o = oh.transpose(0, 2, 1, 3).reshape(B, Nq, internal)
    out = o @ params["out_w"].T + params["out_b"]
    return out, attn


# ---------------------------------- Main ------------------------------------- #

if __name__ == "__main__":
    embedding_dim = 32
    num_heads = 4
    B, Nq, Nk = 2, 8, 8

    key = jax.random.PRNGKey(0)
    kp_, kq_, kk_, kv_ = jax.random.split(key, 4)

    params = init_attention_params(kp_, embedding_dim, num_heads, 1)
    q = jax.random.normal(kq_, (B, Nq, embedding_dim), jnp.float32)
    k = jax.random.normal(kk_, (B, Nk, embedding_dim), jnp.float32)
    v = jax.random.normal(kv_, (B, Nk, embedding_dim), jnp.float32)

    # f32 path (checked tightly against the pure-JAX reference)
    out, attn = attention_forward(params, q, k, v, num_heads)
    out = jax.block_until_ready(out)
    attn = jax.block_until_ready(attn)

    out_ref, attn_ref = attention_reference(params, q, k, v, num_heads)
    assert out.shape == (B, Nq, embedding_dim)
    assert attn.shape == (B, num_heads, Nq, Nk)
    assert jnp.allclose(out, out_ref, atol=1e-4, rtol=1e-4), \
        float(jnp.max(jnp.abs(out - out_ref)))
    assert jnp.allclose(attn, attn_ref, atol=1e-4, rtol=1e-4), \
        float(jnp.max(jnp.abs(attn - attn_ref)))

    # downsampled-embedding config (downsample_rate=2), f32 exactness check
    params2 = init_attention_params(kp_, 64, num_heads, 2)
    q2 = jax.random.normal(kq_, (B, Nq, 64), jnp.float32)
    k2 = jax.random.normal(kk_, (B, Nk, 64), jnp.float32)
    v2 = jax.random.normal(kv_, (B, Nk, 64), jnp.float32)
    out2, attn2 = attention_forward(params2, q2, k2, v2, num_heads)
    out2 = jax.block_until_ready(out2)
    out2_ref, attn2_ref = attention_reference(params2, q2, k2, v2, num_heads)
    assert jnp.allclose(out2, out2_ref, atol=1e-4, rtol=1e-4)
    assert jnp.allclose(attn2, attn2_ref, atol=1e-4, rtol=1e-4)

    # exercise the multi-step K reduction path of the linear kernel
    klx, klw, klb = jax.random.split(kp_, 3)
    xl = jax.random.normal(klx, (16, 256), jnp.float32)
    wl = jax.random.normal(klw, (256, 128), jnp.float32) * 0.06
    bl = jax.random.normal(klb, (128,), jnp.float32)
    yl = jax.block_until_ready(
        pallas_linear(xl, wl, bl, out_dtype=jnp.float32, tk_target=128))
    assert jnp.allclose(yl, xl @ wl + bl, atol=1e-4, rtol=1e-4)

    # bf16 MXU-input path: bf16 weights/activations/attn writeback, f32 accum.
    out_bf, attn_bf = attention_forward(params, q, k, v, num_heads,
                                        use_bf16=True,
                                        attn_dtype=jnp.bfloat16)
    out_bf = jax.block_until_ready(out_bf)
    assert jnp.allclose(out_bf.astype(jnp.float32), out_ref,
                        atol=1e-1, rtol=1e-1)
    assert jnp.allclose(attn_bf.astype(jnp.float32), attn_ref,
                        atol=1e-1, rtol=1e-1)

    print("KERNEL_OK")
</pallas_src>

<mosaic_0001>
module attributes {stable_mosaic.version = 11 : i64} {
  func.func @linear_kernel_single(%arg0: i32, %arg1: i32, %arg2: memref<16x32xf32, #tpu.memory_space<vmem>>, %arg3: memref<32x32xf32, #tpu.memory_space<vmem>>, %arg4: memref<1x32xf32, #tpu.memory_space<vmem>>, %arg5: memref<16x32xf32, #tpu.memory_space<vmem>>) attributes {dimension_semantics = [#tpu.dimension_semantics<parallel>, #tpu.dimension_semantics<parallel>], iteration_bounds = array<i64: 1, 1>, scalar_prefetch = 0 : i64, scratch_operands = 0 : i64, tpu.core_type = #tpu.core_type<tc>, window_params = [{transform_indices = @transform_0, window_bounds = array<i64: 16, 32>}, {transform_indices = @transform_1, window_bounds = array<i64: 32, 32>}, {transform_indices = @transform_2, window_bounds = array<i64: 1, 32>}, {transform_indices = @transform_3, window_bounds = array<i64: 16, 32>}]} {
    %c0 = arith.constant 0 : index
    %c0_0 = arith.constant 0 : index
    %0 = vector.load %arg2[%c0, %c0_0] : memref<16x32xf32, #tpu.memory_space<vmem>>, vector<16x32xf32>
    %c0_1 = arith.constant 0 : index
    %c0_2 = arith.constant 0 : index
    %1 = vector.load %arg3[%c0_1, %c0_2] : memref<32x32xf32, #tpu.memory_space<vmem>>, vector<32x32xf32>
    %cst = arith.constant dense<0.000000e+00> : vector<16x32xf32>
    %2 = tpu.matmul %0, %1, %cst {dimension_numbers = #tpu.dot_dimension_numbers<[1], [0], [0], [1], [0, 0, 1, 1], [], []>} : vector<16x32xf32>, vector<32x32xf32>, vector<16x32xf32> -> vector<16x32xf32>
    %c0_3 = arith.constant 0 : index
    %c0_4 = arith.constant 0 : index
    %3 = vector.load %arg4[%c0_3, %c0_4] : memref<1x32xf32, #tpu.memory_space<vmem>>, vector<1x32xf32>
    %4 = vector.broadcast %3 : vector<1x32xf32> to vector<16x32xf32>
    %5 = arith.addf %2, %4 : vector<16x32xf32>
    %c0_5 = arith.constant 0 : index
    %c0_6 = arith.constant 0 : index
    %6 = vector.load %arg5[%c0_5, %c0_6] : memref<16x32xf32, #tpu.memory_space<vmem>>, vector<16x32xf32>
    tpu.vector_store %arg5[%c0_5, %c0_6], %5 {strides = array<i32>} : memref<16x32xf32, #tpu.memory_space<vmem>>, vector<16x32xf32>,
    return
  }
  func.func @transform_0(%arg0: i32, %arg1: i32) -> (i32, i32) {
    %c0_i32 = arith.constant 0 : i32
    %c0_i32_0 = arith.constant 0 : i32
    return %arg0, %c0_i32 : i32, i32
  }
  func.func @transform_1(%arg0: i32, %arg1: i32) -> (i32, i32) {
    %c0_i32 = arith.constant 0 : i32
    %c0_i32_0 = arith.constant 0 : i32
    return %c0_i32, %arg1 : i32, i32
  }
  func.func @transform_2(%arg0: i32, %arg1: i32) -> (i32, i32) {
    %c0_i32 = arith.constant 0 : i32
    %c0_i32_0 = arith.constant 0 : i32
    return %c0_i32, %arg1 : i32, i32
  }
  func.func @transform_3(%arg0: i32, %arg1: i32) -> (i32, i32) {
    %c0_i32 = arith.constant 0 : i32
    return %arg0, %arg1 : i32, i32
  }
}

</mosaic_0001>

<bundles_post_ra>
// kernel: tpu_custom_call.1
= control target key start
LH: loop header
LB: loop body
LE: loop exit
PB: predicated region body
PF: predicated region fallthrough
CT: control target
= control target key end

     0   :  { %8 = vsyncpa [#allocation3], 0  ;;  %s299_s0 = inlined_call_operand.hbm [shape: f32[16,32], index: 0, kind: input, shape index: {}]   ;;  %s300_s1 = inlined_call_operand.hbm [shape: f32[32,32], index: 1, kind: input, shape index: {}]   ;;  %s301_s2 = inlined_call_operand.vmem [shape: f32[1,32], index: 2, kind: input, shape index: {}]   ;;  %s302_s3 = inlined_call_operand.hbm [shape: f32[16,32], index: 3, kind: output, shape index: {}]  }
   0x1   :  { %9 = vsyncpa [#allocation6], 0 }
   0x2   :  { %10 = vsyncpa [#allocation4], 0  ;;  %s249_s12 = smov [#allocation2]  }
   0x3   :  { %s16_s13 = sshll.u32 %s249_s12, 4  ;;  %s17_s13 = int_to_ptr.vmem [resolvable:$true] %s16_s13 }
   0x4   :  { %s191_s14 = scalar_lea.vmem %s17_s13, 256  ;;  %p196_p1 = scmp.lt.s32.totalorder %s17_s13, %s17_s13 }
   0x5   :  { %p192_p0 = scmp.ne.s32.totalorder %s17_s13, %s191_s14  ;;  %p197_p2 = scmp.lt.s32.totalorder %s191_s14, %s191_s14 }
   0x7   :  { %p198_p3 = por %p197_p2, %p196_p1 }
   0x9   :  { %p199_p4 = pnand %p198_p3, %p192_p0 }
   0xb   :  { %202 = shalt.err (!%p199_p4)
}
   0xc   :  { %s250_s15 = smov 128   ;;  %s251_s16 = smov 8  }
   0xd   :  { %22 = dma.hbm_to_vmem [thread:$0]  %s299_s0, 256, %s17_s13, [#allocation3], %s250_s15, %s250_s15, %s251_s16  }
   0xe   :  { %s252_s19 = smov [#allocation5]  }
   0xf   :  { %s28_s20 = sshll.u32 %s252_s19, 4  ;;  %s29_s20 = int_to_ptr.vmem [resolvable:$true] %s28_s20 }
  0x10   :  { %s211_s21 = scalar_lea.vmem %s29_s20, 512  ;;  %p216_p6 = scmp.lt.s32.totalorder %s29_s20, %s29_s20 }
  0x11   :  { %p212_p5 = scmp.ne.s32.totalorder %s29_s20, %s211_s21  ;;  %p217_p7 = scmp.lt.s32.totalorder %s211_s21, %s211_s21 }
  0x13   :  { %p218_p8 = por %p217_p7, %p216_p6 }
  0x15   :  { %p219_p9 = pnand %p218_p8, %p212_p5 }
  0x17   :  { %222 = shalt.err (!%p219_p9)
}
  0x18   :  { %34 = dma.hbm_to_vmem [thread:$0]  %s300_s1, 512, %s29_s20, [#allocation6], %s250_s15, %s250_s15, %s251_s16  }
  0x19   :  { %243 = dma.done.wait [#allocation3], 256  }
  0x1a   :  { %244 = vsyncadd [#allocation3], 4294967040 }
  0x1b   :  { %245 = dma.done.wait [#allocation6], 512  }
  0x1c   :  { %246 = vsyncadd [#allocation6], 4294966784  ;;  %vm56_vm0 = vcmask 261120   ;;  %v48_v0 = vld [vmem:[#allocation5 + $0x18] sm:$0xff]  ;;  %v47_v1 = vld [vmem:[#allocation5 + $0x10] sm:$0xff]  ;;  %s253_s24 = smov [#allocation7]  }
  0x1d   :  { %167 = vmatprep.subr.mxu0 %v48_v0  ;;  %v43_v2 = vld [vmem:[#allocation2] sm:$0xff]  ;;  %v46_v3 = vld [vmem:[#allocation5 + $0x8] sm:$0xff]  ;;  %v45_v4 = vld [vmem:[#allocation5] sm:$0xff]  ;;  %s145_s25 = sshll.u32 %s253_s24, 4  ;;  %s146_s25 = int_to_ptr.vmem [resolvable:$true] %s145_s25 }
  0x1e   :  { %168 = vmatpush3.msra.mxu0 %v48_v0  ;;  %175 = vmatprep.mubr.msk.f32.mxu0 %vm56_vm0, %v43_v2  ;;  %v44_v5 = vld [vmem:[#allocation2 + $0x8] sm:$0xff]  ;;  %v158_v6 = vld [vmem:[%s301_s2] ss:$0 sm:$0xff]  ;;  %s223_s26 = scalar_lea.vmem %s146_s25, 256  ;;  %p228_p11 = scmp.lt.s32.totalorder %s146_s25, %s146_s25 }
  0x1f   :  { %169 = vmatprep.subr.mxu0 %v47_v1  ;;  %p224_p10 = scmp.ne.s32.totalorder %s146_s25, %s223_s26  ;;  %p229_p12 = scmp.lt.s32.totalorder %s223_s26, %s223_s26 }
  0x20   :  { %170 = vmatpush3.msra.mxu0 %v47_v1 }
  0x21   :  { %171 = vmatprep.subr.mxu0 %v46_v3  ;;  %p230_p13 = por %p229_p12, %p228_p11 }
  0x22   :  { %172 = vmatpush3.msra.mxu0 %v46_v3 }
  0x23   :  { %173 = vmatprep.subr.mxu0 %v45_v4  ;;  %p231_p0 = pnand %p230_p13, %p224_p10 }
  0x24   :  { %174 = vmatpush3.msra.mxu0 %v45_v4 }
  0x25   :  { %176 = vmatmul.mubr.msk.f32.vlgmr.msra.gmra.mxu0 %vm56_vm0, %v44_v5 }
  0xe5   :  { %v177_v7 = vpop.f32.mrf.mxu0 }
  0xe6   :  { %v135_v8 = vadd.f32 %v177_v7, %v158_v6 }
  0xe7   :  { %v129_v9 = vpop.f32.mrf.mxu0 }
  0xe8   :  { %139 = vst.msk [vmem:[#allocation7 + $0x8] sm:$0xff] %vm56_vm0, %v135_v8  ;;  %v130_v10 = vadd.f32 %v158_v6, %v129_v9 }
  0xea   :  { %138 = vst.msk [vmem:[#allocation7] sm:$0xff] %vm56_vm0, %v130_v10 }
  0xeb   :  { %234 = shalt.err (!%p231_p0)
}
  0xec   :  { %151 = dma.vmem_to_hbm [thread:$0]  %s146_s25, 256, %s302_s3, [#allocation4], %s250_s15, %s250_s15, %s251_s16  }
  0xed   :  { %247 = dma.done.wait [#allocation4], 256  }
  0xee   :  { %248 = vsyncadd [#allocation4], 4294967040 }
  0xef   :  { %155 = vsyncpa [#allocation3], 1 }
  0xf0   :  { %156 = vsyncpa [#allocation6], 1 }
  0xf1   :  { %157 = vsyncpa [#allocation4], 1 }

</bundles_post_ra>
